<compile_context>
chip_gen: v7x
topology: tpu7x:2x2x1
jax: 0.10.0
libtpu: 0.0.40
codegen_flags: <defaults>
</compile_context>

<pallas_src>
import jax
import jax.numpy as jnp
from jax.experimental import pallas as pl
from jax.experimental.pallas import tpu as pltpu


def _linear_model_kernel(x_ref, w1t_ref, b1_ref, w2_ref, b2_ref, out_ref):
    # x_ref  : (TB, F) f32   -- row-major batch tile (bf16 cast done here)
    # w1t_ref: (F, F)  bf16  -- fc1 weight transposed (in, out); MXU-stationary RHS
    # b1_ref : (1, F)  f32   -- lane-dense fc1 bias row
    # w2_ref : (1, F)  f32   -- lane-dense fc2 weight row
    # b2_ref : (1, 1)  f32   -- fc2 bias scalar in SMEM
    # out_ref: (TB, 1) f32   -- sigmoid outputs
    x = x_ref[...].astype(jnp.bfloat16)
    # fc1 on the MXU: h = x @ W1^T, f32 accumulation.
    h = jnp.dot(x, w1t_ref[...], preferred_element_type=jnp.float32)
    # Bias + ReLU in f32 on the VPU (v5e-safe; bf16 tail on v6e/v7x is a
    # modest optional win).
    h = jnp.maximum(h + b1_ref[...], 0.0)
    # fc2 (F -> 1): VPU multiply + lane reduce (XLU), not a degenerate matmul.
    o = jnp.sum(h * w2_ref[...], axis=1, keepdims=True) + b2_ref[0, 0]
    # Exact, numerically stable sigmoid (only TB elements -> cost is noise).
    e = jnp.exp(-jnp.abs(o))
    sig = jnp.where(o >= 0.0, 1.0 / (1.0 + e), e / (1.0 + e))
    out_ref[...] = sig.astype(out_ref.dtype)


def linear_model_forward(x, w1, b1, w2, b2, *, block_batch=512):
    """Forward pass of LinearModel: sigmoid(fc2(relu(fc1(x)))).

    Args:
      x : (B, F) float32 input (row-major, consumed as-is -- no layout pass).
      w1: (F, F) fc1.weight in PyTorch (out_features, in_features) layout.
      b1: (F,)   fc1.bias.
      w2: (1, F) fc2.weight.
      b2: (1,)   fc2.bias.
    Returns:
      (B, 1) sigmoid outputs.
    """
    B, F = x.shape

    # Batch tiling: big tiles amortize the ~0.35us/step overhead; whole batch
    # in one (possibly partial) tile when it fits.  block_batch=512 is a
    # multiple of 256 (v6e/v7x MXU width) and 128 (v5e).
    if B <= block_batch:
        TB = ((B + 7) // 8) * 8          # single tile, sublane-aligned
    else:
        TB = block_batch
    num_tiles = pl.cdiv(B, TB)
    # TODO(synk): on v7x, for very large B prefer num_tiles >= 2 so the
    # "parallel" batch axis can occupy both TensorCores.

    # One-time parameter plumbing: O(F^2) work, no pass over x.
    w1t = w1.T.astype(jnp.bfloat16)                 # (F, F) stationary RHS
    b1_r = b1.reshape(1, F).astype(jnp.float32)     # lane-dense row
    w2_r = w2.reshape(1, F).astype(jnp.float32)     # lane-dense row
    b2_s = b2.reshape(1, 1).astype(jnp.float32)     # SMEM scalar

    cost = pl.CostEstimate(
        flops=2 * B * F * F + 4 * B * F,
        transcendentals=B,
        bytes_accessed=B * F * 4 + F * F * 2 + 2 * F * 4 + 4 + B * 4,
    )

    # VMEM: 2x double-buffered x tile + f32 h intermediate + resident weights.
    vmem_est = 3 * TB * F * 4 + 2 * F * F * 2 + 4 * F * 4 + 4 * TB * 4 + (1 << 20)
    vmem_limit = int(min(max(vmem_est, 16 << 20), 100 << 20))

    out = pl.pallas_call(
        _linear_model_kernel,
        out_shape=jax.ShapeDtypeStruct((B, 1), jnp.float32),
        grid_spec=pltpu.PrefetchScalarGridSpec(
            num_scalar_prefetch=0,
            grid=(num_tiles,),
            in_specs=[
                pl.BlockSpec((TB, F), lambda i: (i, 0)),            # x tile (pipelined; ragged last tile masked)
                pl.BlockSpec((F, F), lambda i: (0, 0)),             # W1^T (VMEM-resident)
                pl.BlockSpec((1, F), lambda i: (0, 0)),             # b1 row
                pl.BlockSpec((1, F), lambda i: (0, 0)),             # w2 row
                pl.BlockSpec(memory_space=pltpu.MemorySpace.SMEM),  # b2 scalar
            ],
            out_specs=pl.BlockSpec((TB, 1), lambda i: (i, 0)),
        ),
        compiler_params=pltpu.CompilerParams(
            # Independent batch tiles -> shard across TCs on v7x.
            dimension_semantics=("parallel",),
            vmem_limit_bytes=vmem_limit,
            # TODO(synk): for large F on v7x (64 MiB VMEM), single-buffer the
            # constant-index-map operands (w1t/b1/w2) via
            # pipeline_mode=pl.Buffered(1) and re-derive TB with headroom.
        ),
        cost_estimate=cost,
    )(x.astype(jnp.float32), w1t, b1_r, w2_r, b2_s)

    return out.astype(x.dtype)


def init_params(key, n_features):
    """PyTorch nn.Linear-style uniform(-1/sqrt(fan_in), 1/sqrt(fan_in)) init."""
    k1, k2, k3, k4 = jax.random.split(key, 4)
    bound = 1.0 / jnp.sqrt(n_features)
    w1 = jax.random.uniform(k1, (n_features, n_features), jnp.float32, -bound, bound)
    b1 = jax.random.uniform(k2, (n_features,), jnp.float32, -bound, bound)
    w2 = jax.random.uniform(k3, (1, n_features), jnp.float32, -bound, bound)
    b2 = jax.random.uniform(k4, (1,), jnp.float32, -bound, bound)
    return w1, b1, w2, b2


if __name__ == "__main__":
    key = jax.random.PRNGKey(0)
    kx, kp = jax.random.split(key)

    batch = 200          # small demo; exercises the single-partial-tile path
    n_features = 64      # n_classes is unused by the module's forward

    x = jax.random.normal(kx, (batch, n_features), jnp.float32)
    w1, b1, w2, b2 = init_params(kp, n_features)

    out = linear_model_forward(x, w1, b1, w2, b2)
    out = jax.block_until_ready(out)

    # Reference (same math as the PyTorch forward), with the same bf16
    # rounding of the MXU operands (intentional precision choice vs f32 torch).
    xq = x.astype(jnp.bfloat16).astype(jnp.float32)
    w1q = w1.astype(jnp.bfloat16).astype(jnp.float32)
    h_ref = jnp.maximum(xq @ w1q.T + b1[None, :], 0.0)
    ref = jax.nn.sigmoid(h_ref @ w2.T + b2[None, :])

    assert out.shape == (batch, 1)
    assert jnp.allclose(out, ref, atol=2e-3, rtol=2e-3), float(jnp.max(jnp.abs(out - ref)))

    print("KERNEL_OK")
</pallas_src>

<mosaic_0001>
module attributes {stable_mosaic.version = 11 : i64} {
  func.func @_linear_model_kernel(%arg0: i32, %arg1: memref<200x64xf32, #tpu.memory_space<vmem>>, %arg2: memref<64x64xbf16, #tpu.memory_space<vmem>>, %arg3: memref<1x64xf32, #tpu.memory_space<vmem>>, %arg4: memref<1x64xf32, #tpu.memory_space<vmem>>, %arg5: memref<1x1xf32, #tpu.memory_space<smem>>, %arg6: memref<200x1xf32, #tpu.memory_space<vmem>>) attributes {dimension_semantics = [#tpu.dimension_semantics<parallel>], iteration_bounds = array<i64: 1>, scalar_prefetch = 0 : i64, scratch_operands = 0 : i64, tpu.core_type = #tpu.core_type<tc>, window_params = [{transform_indices = @transform_0, window_bounds = array<i64: 200, 64>}, {pipeline_mode = #tpu.pipeline_mode<synchronous>, transform_indices = @transform_1, window_bounds = array<i64: 64, 64>}, {pipeline_mode = #tpu.pipeline_mode<synchronous>, transform_indices = @transform_2, window_bounds = array<i64: 1, 64>}, {pipeline_mode = #tpu.pipeline_mode<synchronous>, transform_indices = @transform_3, window_bounds = array<i64: 1, 64>}, {transform_indices = @transform_4, window_bounds = array<i64: 1, 1>}, {transform_indices = @transform_5, window_bounds = array<i64: 200, 1>}]} {
    %c0 = arith.constant 0 : index
    %c0_0 = arith.constant 0 : index
    %0 = vector.load %arg1[%c0, %c0_0] : memref<200x64xf32, #tpu.memory_space<vmem>>, vector<200x64xf32>
    %1 = arith.truncf %0 : vector<200x64xf32> to vector<200x64xbf16>
    %c0_1 = arith.constant 0 : index
    %c0_2 = arith.constant 0 : index
    %2 = vector.load %arg2[%c0_1, %c0_2] : memref<64x64xbf16, #tpu.memory_space<vmem>>, vector<64x64xbf16>
    %cst = arith.constant dense<0.000000e+00> : vector<200x64xf32>
    %3 = tpu.matmul %1, %2, %cst {dimension_numbers = #tpu.dot_dimension_numbers<[1], [0], [0], [1], [0, 0, 1, 1], [], []>} : vector<200x64xbf16>, vector<64x64xbf16>, vector<200x64xf32> -> vector<200x64xf32>
    %c0_3 = arith.constant 0 : index
    %c0_4 = arith.constant 0 : index
    %4 = vector.load %arg3[%c0_3, %c0_4] : memref<1x64xf32, #tpu.memory_space<vmem>>, vector<1x64xf32>
    %5 = vector.broadcast %4 : vector<1x64xf32> to vector<200x64xf32>
    %6 = arith.addf %3, %5 : vector<200x64xf32>
    %cst_5 = arith.constant 0.000000e+00 : f32
    %7 = vector.broadcast %cst_5 : f32 to vector<200x64xf32>
    %8 = arith.maximumf %6, %7 : vector<200x64xf32>
    %c0_6 = arith.constant 0 : index
    %c0_7 = arith.constant 0 : index
    %9 = vector.load %arg4[%c0_6, %c0_7] : memref<1x64xf32, #tpu.memory_space<vmem>>, vector<1x64xf32>
    %10 = vector.broadcast %9 : vector<1x64xf32> to vector<200x64xf32>
    %11 = arith.mulf %8, %10 : vector<200x64xf32>
    %cst_8 = arith.constant dense<0.000000e+00> : vector<200xf32>
    %12 = vector.multi_reduction <add>, %11, %cst_8 [1] : vector<200x64xf32> to vector<200xf32>
    %13 = vector.shape_cast %12 : vector<200xf32> to vector<200x1xf32>
    %c0_9 = arith.constant 0 : index
    %c0_10 = arith.constant 0 : index
    %14 = memref.load %arg5[%c0_9, %c0_10] : memref<1x1xf32, #tpu.memory_space<smem>>
    %15 = vector.broadcast %14 : f32 to vector<200x1xf32>
    %16 = arith.addf %13, %15 : vector<200x1xf32>
    %17 = math.absf %16 : vector<200x1xf32>
    %cst_11 = arith.constant 0.000000e+00 : f32
    %18 = vector.broadcast %cst_11 : f32 to vector<200x1xf32>
    %19 = arith.subf %18, %17 : vector<200x1xf32>
    %20 = math.exp %19 : vector<200x1xf32>
    %cst_12 = arith.constant 0.000000e+00 : f32
    %21 = vector.broadcast %cst_12 : f32 to vector<200x1xf32>
    %22 = arith.cmpf oge, %16, %21 : vector<200x1xf32>
    %cst_13 = arith.constant 1.000000e+00 : f32
    %23 = vector.broadcast %cst_13 : f32 to vector<200x1xf32>
    %24 = arith.addf %23, %20 : vector<200x1xf32>
    %cst_14 = arith.constant 1.000000e+00 : f32
    %25 = vector.broadcast %cst_14 : f32 to vector<200x1xf32>
    %26 = arith.divf %25, %24 : vector<200x1xf32>
    %cst_15 = arith.constant 1.000000e+00 : f32
    %27 = vector.broadcast %cst_15 : f32 to vector<200x1xf32>
    %28 = arith.addf %27, %20 : vector<200x1xf32>
    %29 = arith.divf %20, %28 : vector<200x1xf32>
    %30 = arith.select %22, %26, %29 : vector<200x1xi1>, vector<200x1xf32>
    %c0_16 = arith.constant 0 : index
    %c0_17 = arith.constant 0 : index
    %31 = vector.load %arg6[%c0_16, %c0_17] : memref<200x1xf32, #tpu.memory_space<vmem>>, vector<200x1xf32>
    tpu.vector_store %arg6[%c0_16, %c0_17], %30 {strides = array<i32>} : memref<200x1xf32, #tpu.memory_space<vmem>>, vector<200x1xf32>,
    return
  }
  func.func @transform_0(%arg0: i32) -> (i32, i32) {
    %c0_i32 = arith.constant 0 : i32
    %c0_i32_0 = arith.constant 0 : i32
    return %arg0, %c0_i32 : i32, i32
  }
  func.func @transform_1(%arg0: i32) -> (i32, i32) {
    %c0_i32 = arith.constant 0 : i32
    %c0_i32_0 = arith.constant 0 : i32
    %c0_i32_1 = arith.constant 0 : i32
    return %c0_i32, %c0_i32_0 : i32, i32
  }
  func.func @transform_2(%arg0: i32) -> (i32, i32) {
    %c0_i32 = arith.constant 0 : i32
    %c0_i32_0 = arith.constant 0 : i32
    %c0_i32_1 = arith.constant 0 : i32
    return %c0_i32, %c0_i32_0 : i32, i32
  }
  func.func @transform_3(%arg0: i32) -> (i32, i32) {
    %c0_i32 = arith.constant 0 : i32
    %c0_i32_0 = arith.constant 0 : i32
    %c0_i32_1 = arith.constant 0 : i32
    return %c0_i32, %c0_i32_0 : i32, i32
  }
  func.func @transform_4(%arg0: i32) -> (i32, i32) {
    %c0_i32 = arith.constant 0 : i32
    %c0_i32_0 = arith.constant 0 : i32
    %c0_i32_1 = arith.constant 0 : i32
    return %c0_i32, %c0_i32_0 : i32, i32
  }
  func.func @transform_5(%arg0: i32) -> (i32, i32) {
    %c0_i32 = arith.constant 0 : i32
    %c0_i32_0 = arith.constant 0 : i32
    return %arg0, %c0_i32 : i32, i32
  }
}

</mosaic_0001>

<bundles_post_ra>
// kernel: tpu_custom_call.1
= control target key start
LH: loop header
LB: loop body
LE: loop exit
PB: predicated region body
PF: predicated region fallthrough
CT: control target
= control target key end

     0   :  { %v924_v0 = vmov 0.0   ;;  %vm925_vm0 = vmmov 0   ;;  %vm99_vm1 = vcmask 523264   ;;  %vm684_vm2 = vcmask 7168   ;;  %s1487_s1 = inlined_call_operand.vmem [shape: bf16[64,64], index: 1, kind: input, shape index: {}]   ;;  %s1488_s0 = inlined_call_operand.vmem [shape: f32[200,64], index: 0, kind: input, shape index: {}]   ;;  %s1489_s2 = inlined_call_operand.vmem [shape: f32[1,64], index: 2, kind: input, shape index: {}]   ;;  %s1490_s3 = inlined_call_operand.vmem [shape: f32[1,64], index: 3, kind: input, shape index: {}]   ;;  %s1491_s4 = inlined_call_operand.<no memory space> [shape: f32[1,1], index: 4, kind: input, shape index: {}]   ;;  %s1492_s5 = inlined_call_operand.vmem [shape: f32[200,1], index: 5, kind: output, shape index: {}]  }
   0x1   :  { %750 = vmatprep.subr.bf16.mxu0 %v924_v0  ;;  %810 = vmatprep.subr.bf16.mxu1 %v924_v0  ;;  %v820_v1 = vld [vmem:[%s1487_s1] sm:$0xff]   ;;  %v821_v2 = vld [vmem:[%s1487_s1 + $0x8] sm:$0xff]   ;;  %v822_v3 = vld [vmem:[%s1487_s1 + $0x10] sm:$0xff]  }
   0x2   :  { %758 = vmatprep.mubr.msk.bf16.mxu0 %vm925_vm0, %v924_v0  ;;  %786 = vmatprep.mubr.msk.bf16.mxu1 %vm925_vm0, %v924_v0  ;;  %v823_v4 = vld [vmem:[%s1487_s1 + $0x18] sm:$0xff]   ;;  %v22_v5 = vld [vmem:[%s1488_s0] sm:$0xff]  ;;  %v23_v6 = vld [vmem:[%s1488_s0 + $0x8] sm:$0xff] }
   0x3   :  { %751 = vmatpush3.bf16.msra.mxu0 %v820_v1  ;;  %814 = vmatpush3.bf16.msra.mxu1 %v820_v1  ;;  %v36_v7 = vld [vmem:[%s1488_s0 + $0x70] sm:$0xff]  ;;  %v37_v8 = vld [vmem:[%s1488_s0 + $0x78] sm:$0xff]  ;;  %v47_v9 = vpack.c.bf16 %v23_v6, %v22_v5  ;;  %v38_v13 = vld [vmem:[%s1488_s0 + $0x80] sm:$0xff] }
   0x4   :  { %752 = vmatprep.subr.bf16.mxu0 %v924_v0  ;;  %811 = vmatprep.subr.bf16.mxu1 %v924_v0  ;;  %v54_v10 = vpack.c.bf16 %v37_v8, %v36_v7  ;;  %v24_v11 = vld [vmem:[%s1488_s0 + $0x10] sm:$0xff]  ;;  %v25_v12 = vld [vmem:[%s1488_s0 + $0x18] sm:$0xff]  ;;  %v39_v14 = vld [vmem:[%s1488_s0 + $0x88] sm:$0xff] }
   0x5   :  { %v48_v15 = vpack.c.bf16 %v25_v12, %v24_v11  ;;  %v55_v16 = vpack.c.bf16 %v39_v14, %v38_v13  ;;  %v26_v17 = vld [vmem:[%s1488_s0 + $0x20] sm:$0xff]  ;;  %v27_v18 = vld [vmem:[%s1488_s0 + $0x28] sm:$0xff]  ;;  %v40_v19 = vld [vmem:[%s1488_s0 + $0x90] sm:$0xff] }
   0x6   :  { %v41_v20 = vld [vmem:[%s1488_s0 + $0x98] sm:$0xff]  ;;  %v49_v21 = vpack.c.bf16 %v27_v18, %v26_v17  ;;  %v28_v23 = vld [vmem:[%s1488_s0 + $0x30] sm:$0xff]  ;;  %v42_v25 = vld [vmem:[%s1488_s0 + $0xa0] sm:$0xff] }
   0x7   :  { %753 = vmatpush3.bf16.msra.mxu0 %v821_v2  ;;  %815 = vmatpush3.bf16.msra.mxu1 %v821_v2  ;;  %v56_v22 = vpack.c.bf16 %v41_v20, %v40_v19  ;;  %v29_v24 = vld [vmem:[%s1488_s0 + $0x38] sm:$0xff]  ;;  %v43_v26 = vld [vmem:[%s1488_s0 + $0xa8] sm:$0xff]  ;;  %v30_v29 = vld [vmem:[%s1488_s0 + $0x40] sm:$0xff] }
   0x8   :  { %754 = vmatprep.subr.bf16.mxu0 %v924_v0  ;;  %812 = vmatprep.subr.bf16.mxu1 %v924_v0  ;;  %v50_v27 = vpack.c.bf16 %v29_v24, %v28_v23  ;;  %v57_v28 = vpack.c.bf16 %v43_v26, %v42_v25  ;;  %v31_v30 = vld [vmem:[%s1488_s0 + $0x48] sm:$0xff]  ;;  %v44_v31 = vld [vmem:[%s1488_s0 + $0xb0] sm:$0xff]  ;;  %v45_v32 = vld [vmem:[%s1488_s0 + $0xb8] sm:$0xff] }
   0x9   :  { %v51_v33 = vpack.c.bf16 %v31_v30, %v30_v29  ;;  %v58_v34 = vpack.c.bf16 %v45_v32, %v44_v31  ;;  %v32_v35 = vld [vmem:[%s1488_s0 + $0x50] sm:$0xff]  ;;  %v33_v36 = vld [vmem:[%s1488_s0 + $0x58] sm:$0xff]  ;;  %v46_v37 = vld [vmem:[%s1488_s0 + $0xc0] sm:$0xff] }
   0xa   :  { %v52_v38 = vpack.c.bf16 %v33_v36, %v32_v35  ;;  %v59_v39 = vpack.c.bf16 %v46_v37, %v46_v37  ;;  %v34_v40 = vld [vmem:[%s1488_s0 + $0x60] sm:$0xff]  ;;  %v35_v41 = vld [vmem:[%s1488_s0 + $0x68] sm:$0xff] }
   0xb   :  { %755 = vmatpush3.bf16.msra.mxu0 %v822_v3  ;;  %816 = vmatpush3.bf16.msra.mxu1 %v822_v3  ;;  %v53_v42 = vpack.c.bf16 %v35_v41, %v34_v40  ;;  %v1093_v43 = vld [vmem:[%s1489_s2] ss:$0 sm:$0xff] }
   0xc   :  { %756 = vmatprep.subr.bf16.mxu0 %v924_v0  ;;  %813 = vmatprep.subr.bf16.mxu1 %v924_v0  ;;  %v1100_v52 = vld [vmem:[%s1490_s3] ss:$0 sm:$0xff] }
   0xf   :  { %757 = vmatpush3.bf16.msra.mxu0 %v823_v4  ;;  %817 = vmatpush3.bf16.msra.mxu1 %v823_v4 }
  0x12   :  { %759 = vmatmul.mubr.msk.bf16.vlgmr.msra.gmra.mrb[0].mxu0 %vm99_vm1, %v47_v9  ;;  %787 = vmatmul.mubr.msk.bf16.vlgmr.msra.gmra.mrb[0].mxu1 %vm99_vm1, %v54_v10 }
  0x13   :  { %762 = vmatprep.mubr.msk.bf16.mxu0 %vm925_vm0, %v924_v0  ;;  %790 = vmatprep.mubr.msk.bf16.mxu1 %vm925_vm0, %v924_v0 }
  0x1a   :  { %763 = vmatmul.mubr.msk.bf16.gmra.mrb[4].mxu0 %vm99_vm1, %v48_v15  ;;  %791 = vmatmul.mubr.msk.bf16.gmra.mrb[4].mxu1 %vm99_vm1, %v55_v16 }
  0x1b   :  { %766 = vmatprep.mubr.msk.bf16.mxu0 %vm925_vm0, %v924_v0  ;;  %794 = vmatprep.mubr.msk.bf16.mxu1 %vm925_vm0, %v924_v0 }
  0x22   :  { %767 = vmatmul.mubr.msk.bf16.gmra.mrb[8].mxu0 %vm99_vm1, %v49_v21  ;;  %795 = vmatmul.mubr.msk.bf16.gmra.mrb[8].mxu1 %vm99_vm1, %v56_v22 }
  0x23   :  { %770 = vmatprep.mubr.msk.bf16.mxu0 %vm925_vm0, %v924_v0  ;;  %798 = vmatprep.mubr.msk.bf16.mxu1 %vm925_vm0, %v924_v0 }
  0x2a   :  { %771 = vmatmul.mubr.msk.bf16.gmra.mrb[12].mxu0 %vm99_vm1, %v50_v27  ;;  %799 = vmatmul.mubr.msk.bf16.gmra.mrb[12].mxu1 %vm99_vm1, %v57_v28 }
  0x2b   :  { %774 = vmatprep.mubr.msk.bf16.mxu0 %vm925_vm0, %v924_v0  ;;  %802 = vmatprep.mubr.msk.bf16.mxu1 %vm925_vm0, %v924_v0 }
  0x32   :  { %775 = vmatmul.mubr.msk.bf16.gmra.mrb[16].mxu0 %vm99_vm1, %v51_v33  ;;  %803 = vmatmul.mubr.msk.bf16.gmra.mrb[16].mxu1 %vm99_vm1, %v58_v34 }
  0x33   :  { %778 = vmatprep.mubr.msk.bf16.mxu0 %vm925_vm0, %v924_v0  ;;  %806 = vmatprep.mubr.msk.bf16.mxu1 %vm925_vm0, %v924_v0 }
  0x3a   :  { %779 = vmatmul.mubr.msk.bf16.gmra.mrb[20].mxu0 %vm99_vm1, %v52_v38  ;;  %807 = vmatmul.mubr.msk.bf16.gmra.mrb[20].mxu1 %vm99_vm1, %v59_v39 }
  0x3b   :  { %782 = vmatprep.mubr.msk.bf16.mxu0 %vm925_vm0, %v924_v0 }
  0x42   :  { %783 = vmatmul.mubr.msk.bf16.gmra.mrb[24].mxu0 %vm99_vm1, %v53_v42 }
  0xe5   :  { %v173_v44 = vpop.f32.mrb[0].mxu0  ;;  %v229_v45 = vpop.f32.mrb[0].mxu1 }
  0xe6   :  { %v174_v46 = vadd.f32 %v1093_v43, %v173_v44  ;;  %v230_v47 = vadd.f32 %v1093_v43, %v229_v45  ;;  %v760_v48 = vpop.f32.mrb[1].mxu0  ;;  %v788_v49 = vpop.f32.mrb[1].mxu1 }
  0xe7   :  { %v176_v50 = vpop.f32.mrb[2].mxu0  ;;  %v232_v51 = vpop.f32.mrb[2].mxu1 }
  0xe8   :  { %v275_v53 = vmax.f32 %v174_v46, 0.0  ;;  %v289_v54 = vmax.f32 %v230_v47, 0.0  ;;  %v177_v55 = vadd.f32 %v1093_v43, %v176_v50  ;;  %v233_v56 = vadd.f32 %v1093_v43, %v232_v51  ;;  %v761_v57 = vpop.f32.mrb[3].mxu0  ;;  %v789_v58 = vpop.f32.mrb[3].mxu1 }
  0xea   :  { %v290_v59 = vmax.f32 %v233_v56, 0.0  ;;  %v307_v60 = vmul.f32 %v1100_v52, %v275_v53  ;;  %v321_v61 = vmul.f32 %v1100_v52, %v289_v54  ;;  %v276_v62 = vmax.f32 %v177_v55, 0.0 }
  0xec   :  { %v332_v63 = vsel %vm99_vm1, %v307_v60, 0.0  ;;  %v322_v0 = vmul.f32 %v1100_v52, %v290_v59  ;;  %v374_v7 = vsel %vm99_vm1, %v321_v61, 0.0  ;;  %v308_v11 = vmul.f32 %v1100_v52, %v276_v62 }
  0xed   :  { %333 = vadd.xlane.f32.xlu0 %v332_v63  ;;  %v181_v1 = vpop.f32.mrb[4].mxu0  ;;  %v237_v2 = vpop.f32.mrb[4].mxu1 }
  0xee   :  { %v182_v3 = vadd.f32 %v1093_v43, %v181_v1  ;;  %v764_v4 = vpop.f32.mrb[5].mxu0  ;;  %v377_v5 = vsel %vm99_vm1, %v322_v0, 0.0  ;;  %v238_v6 = vadd.f32 %v1093_v43, %v237_v2  ;;  %v792_v8 = vpop.f32.mrb[5].mxu1  ;;  %v335_v22 = vsel %vm99_vm1, %v308_v11, 0.0 }
  0xef   :  { %378 = vadd.xlane.f32.xlu1 %v377_v5  ;;  %v184_v9 = vpop.f32.mrb[6].mxu0  ;;  %v240_v10 = vpop.f32.mrb[6].mxu1 }
  0xf0   :  { %v277_v12 = vmax.f32 %v182_v3, 0.0  ;;  %v185_v13 = vadd.f32 %v1093_v43, %v184_v9  ;;  %v765_v14 = vpop.f32.mrb[7].mxu0  ;;  %v291_v15 = vmax.f32 %v238_v6, 0.0  ;;  %v241_v16 = vadd.f32 %v1093_v43, %v240_v10  ;;  %v793_v17 = vpop.f32.mrb[7].mxu1 }
  0xf1   :  { %375 = vadd.xlane.f32.xlu0 %v374_v7 }
  0xf2   :  { %v278_v18 = vmax.f32 %v185_v13, 0.0  ;;  %v292_v19 = vmax.f32 %v241_v16, 0.0  ;;  %v309_v20 = vmul.f32 %v1100_v52, %v277_v12  ;;  %v323_v21 = vmul.f32 %v1100_v52, %v291_v15 }
  0xf4   :  { %v338_v23 = vsel %vm99_vm1, %v309_v20, 0.0  ;;  %v310_v24 = vmul.f32 %v1100_v52, %v278_v18  ;;  %v324_v27 = vmul.f32 %v1100_v52, %v292_v19  ;;  %v380_v31 = vsel %vm99_vm1, %v323_v21, 0.0 }
  0xf5   :  { %336 = vadd.xlane.f32.xlu0 %v335_v22  ;;  %339 = vadd.xlane.f32.xlu1 %v338_v23  ;;  %v189_v25 = vpop.f32.mrb[8].mxu0  ;;  %v245_v26 = vpop.f32.mrb[8].mxu1 }
  0xf6   :  { %v190_v28 = vadd.f32 %v1093_v43, %v189_v25  ;;  %v768_v29 = vpop.f32.mrb[9].mxu0  ;;  %v246_v30 = vadd.f32 %v1093_v43, %v245_v26  ;;  %v796_v32 = vpop.f32.mrb[9].mxu1  ;;  %v341_v34 = vsel %vm99_vm1, %v310_v24, 0.0  ;;  %v383_v42 = vsel %vm99_vm1, %v324_v27, 0.0 }
  0xf7   :  { %v192_v33 = vpop.f32.mrb[10].mxu0  ;;  %v248_v35 = vpop.f32.mrb[10].mxu1 }
  0xf8   :  { %v279_v36 = vmax.f32 %v190_v28, 0.0  ;;  %v193_v37 = vadd.f32 %v1093_v43, %v192_v33  ;;  %v769_v38 = vpop.f32.mrb[11].mxu0  ;;  %v293_v39 = vmax.f32 %v246_v30, 0.0  ;;  %v249_v40 = vadd.f32 %v1093_v43, %v248_v35  ;;  %v797_v41 = vpop.f32.mrb[11].mxu1 }
  0xf9   :  { %381 = vadd.xlane.f32.xlu0 %v380_v31  ;;  %342 = vadd.xlane.f32.xlu1 %v341_v34 }
  0xfa   :  { %v280_v44 = vmax.f32 %v193_v37, 0.0  ;;  %v294_v45 = vmax.f32 %v249_v40, 0.0  ;;  %v311_v46 = vmul.f32 %v1100_v52, %v279_v36  ;;  %v325_v47 = vmul.f32 %v1100_v52, %v293_v39 }
  0xfc   :  { %v344_v48 = vsel %vm99_vm1, %v311_v46, 0.0  ;;  %v312_v49 = vmul.f32 %v1100_v52, %v280_v44  ;;  %v326_v53 = vmul.f32 %v1100_v52, %v294_v45  ;;  %v386_v57 = vsel %vm99_vm1, %v325_v47, 0.0 }
  0xfd   :  { %384 = vadd.xlane.f32.xlu1 %v383_v42  ;;  %345 = vadd.xlane.f32.xlu0 %v344_v48  ;;  %v197_v50 = vpop.f32.mrb[12].mxu0  ;;  %v253_v51 = vpop.f32.mrb[12].mxu1 }
  0xfe   :  { %v198_v54 = vadd.f32 %v1093_v43, %v197_v50  ;;  %v772_v55 = vpop.f32.mrb[13].mxu0  ;;  %v254_v56 = vadd.f32 %v1093_v43, %v253_v51  ;;  %v800_v58 = vpop.f32.mrb[13].mxu1  ;;  %v347_v60 = vsel %vm99_vm1, %v312_v49, 0.0  ;;  %v389_v4 = vsel %vm99_vm1, %v326_v53, 0.0 }
  0xff   :  { %v200_v59 = vpop.f32.mrb[14].mxu0  ;;  %v256_v61 = vpop.f32.mrb[14].mxu1 }
 0x100   :  { %v281_v62 = vmax.f32 %v198_v54, 0.0  ;;  %v201_v63 = vadd.f32 %v1093_v43, %v200_v59  ;;  %v773_v0 = vpop.f32.mrb[15].mxu0  ;;  %v295_v1 = vmax.f32 %v254_v56, 0.0  ;;  %v257_v2 = vadd.f32 %v1093_v43, %v256_v61  ;;  %v801_v3 = vpop.f32.mrb[15].mxu1 }
 0x101   :  { %387 = vadd.xlane.f32.xlu0 %v386_v57  ;;  %348 = vadd.xlane.f32.xlu1 %v347_v60 }
 0x102   :  { %v282_v5 = vmax.f32 %v201_v63, 0.0  ;;  %v296_v6 = vmax.f32 %v257_v2, 0.0  ;;  %v313_v7 = vmul.f32 %v1100_v52, %v281_v62  ;;  %v327_v8 = vmul.f32 %v1100_v52, %v295_v1 }
 0x104   :  { %v350_v9 = vsel %vm99_vm1, %v313_v7, 0.0  ;;  %v314_v10 = vmul.f32 %v1100_v52, %v282_v5  ;;  %v392_v16 = vsel %vm99_vm1, %v327_v8, 0.0  ;;  %v328_v18 = vmul.f32 %v1100_v52, %v296_v6 }
 0x105   :  { %390 = vadd.xlane.f32.xlu1 %v389_v4  ;;  %351 = vadd.xlane.f32.xlu0 %v350_v9  ;;  %v205_v11 = vpop.f32.mrb[16].mxu0  ;;  %v261_v12 = vpop.f32.mrb[16].mxu1  ;;  %v1178_v8 = vstv %s1491_s4 }
 0x106   :  { %v206_v13 = vadd.f32 %v1093_v43, %v205_v11  ;;  %v776_v14 = vpop.f32.mrb[17].mxu0  ;;  %v262_v15 = vadd.f32 %v1093_v43, %v261_v12  ;;  %v804_v17 = vpop.f32.mrb[17].mxu1  ;;  %v353_v25 = vsel %vm99_vm1, %v314_v10, 0.0  ;;  %v395_v28 = vsel %vm99_vm1, %v328_v18, 0.0 }
 0x107   :  { %v208_v19 = vpop.f32.mrb[18].mxu0  ;;  %v264_v20 = vpop.f32.mrb[18].mxu1 }
 0x108   :  { %v283_v21 = vmax.f32 %v206_v13, 0.0  ;;  %v209_v22 = vadd.f32 %v1093_v43, %v208_v19  ;;  %v777_v23 = vpop.f32.mrb[19].mxu0  ;;  %v297_v24 = vmax.f32 %v262_v15, 0.0  ;;  %v805_v26 = vpop.f32.mrb[19].mxu1  ;;  %v265_v54 = vadd.f32 %v1093_v43, %v264_v20 }
 0x109   :  { %393 = vadd.xlane.f32.xlu0 %v392_v16  ;;  %354 = vadd.xlane.f32.xlu1 %v353_v25 }
 0x10a   :  { %v284_v27 = vmax.f32 %v209_v22, 0.0  ;;  %v315_v29 = vmul.f32 %v1100_v52, %v283_v21  ;;  %v329_v30 = vmul.f32 %v1100_v52, %v297_v24  ;;  %v298_v63 = vmax.f32 %v265_v54, 0.0 }
 0x10c   :  { %v356_v31 = vsel %vm99_vm1, %v315_v29, 0.0  ;;  %v316_v32 = vmul.f32 %v1100_v52, %v284_v27  ;;  %v398_v37 = vsel %vm99_vm1, %v329_v30, 0.0  ;;  %v330_v7 = vmul.f32 %v1100_v52, %v298_v63 }
 0x10d   :  { %396 = vadd.xlane.f32.xlu1 %v395_v28  ;;  %357 = vadd.xlane.f32.xlu0 %v356_v31  ;;  %v213_v33 = vpop.f32.mrb[20].mxu0  ;;  %v269_v34 = vpop.f32.mrb[20].mxu1 }
 0x10e   :  { %v214_v35 = vadd.f32 %v1093_v43, %v213_v33  ;;  %v780_v36 = vpop.f32.mrb[21].mxu0  ;;  %v808_v38 = vpop.f32.mrb[21].mxu1  ;;  %v359_v45 = vsel %vm99_vm1, %v316_v32, 0.0  ;;  %v270_v49 = vadd.f32 %v1093_v43, %v269_v34 }
 0x10f   :  { %v216_v39 = vpop.f32.mrb[22].mxu0  ;;  %v272_v40 = vpop.f32.mrb[22].mxu1 }
 0x110   :  { %v285_v41 = vmax.f32 %v214_v35, 0.0  ;;  %v217_v42 = vadd.f32 %v1093_v43, %v216_v39  ;;  %v781_v44 = vpop.f32.mrb[23].mxu0  ;;  %v809_v46 = vpop.f32.mrb[23].mxu1  ;;  %v299_v58 = vmax.f32 %v270_v49, 0.0 }
 0x111   :  { %399 = vadd.xlane.f32.xlu0 %v398_v37  ;;  %360 = vadd.xlane.f32.xlu1 %v359_v45 }
 0x112   :  { %v286_v47 = vmax.f32 %v217_v42, 0.0  ;;  %v317_v48 = vmul.f32 %v1100_v52, %v285_v41  ;;  %v331_v2 = vmul.f32 %v1100_v52, %v299_v58 }
 0x114   :  { %v362_v50 = vsel %vm99_vm1, %v317_v48, 0.0  ;;  %v318_v51 = vmul.f32 %v1100_v52, %v286_v47  ;;  %v404_v6 = vsel %vm99_vm1, %v331_v2, 0.0 }
 0x115   :  { %363 = vadd.xlane.f32.xlu0 %v362_v50  ;;  %v221_v53 = vpop.f32.mrb[24].mxu0 }
 0x116   :  { %v222_v55 = vadd.f32 %v1093_v43, %v221_v53  ;;  %v784_v56 = vpop.f32.mrb[25].mxu0  ;;  %v365_v57 = vsel %vm99_vm1, %v318_v51, 0.0 }
 0x117   :  { %366 = vadd.xlane.f32.xlu1 %v365_v57  ;;  %v224_v59 = vpop.f32.mrb[26].mxu0 }
 0x118   :  { %v287_v60 = vmax.f32 %v222_v55, 0.0  ;;  %v225_v61 = vadd.f32 %v1093_v43, %v224_v59  ;;  %v785_v62 = vpop.f32.mrb[27].mxu0  ;;  %v401_v43 = vsel %vm99_vm1, %v330_v7, 0.0 }
 0x11a   :  { %v288_v0 = vmax.f32 %v225_v61, 0.0  ;;  %v319_v1 = vmul.f32 %v1100_v52, %v287_v60 }
 0x11c   :  { %v368_v3 = vsel %vm99_vm1, %v319_v1, 0.0  ;;  %v320_v4 = vmul.f32 %v1100_v52, %v288_v0 }
 0x11d   :  { %369 = vadd.xlane.f32.xlu0 %v368_v3 }
 0x11e   :  { %v371_v5 = vsel %vm99_vm1, %v320_v4, 0.0 }
 0x11f   :  { %372 = vadd.xlane.f32.xlu1 %v371_v5 }
 0x121   :  { %405 = vadd.xlane.f32.xlu0 %v404_v6 }
 0x123   :  { %402 = vadd.xlane.f32.xlu1 %v401_v43 }
 0x17a   :  { %v334_v9 = vpop.xlane.xlu0 %333 }
 0x17b   :  { %v1181_v10 = vadd.f32 %v1178_v8, %v334_v9 }
 0x17c   :  { %v379_v11 = vpop.xlane.xlu1 %378 }
 0x17d   :  { %v434_v12 = vand.u32 2147483647, %v1181_v10  ;;  %v1185_v13 = vadd.f32 %v1178_v8, %v379_v11  ;;  %vm534_vm3 = vcmp.ge.f32.partialorder %v1181_v10, 0.0 }
 0x17e   :  { %v376_v52 = vpop.xlane.xlu0 %375 }
 0x17f   :  { %v459_v14 = vsub.f32 0.0, %v434_v12  ;;  %v449_v15 = vand.u32 2147483647, %v1185_v13  ;;  %v1189_v16 = vadd.f32 %v1178_v8, %v376_v52  ;;  %vm549_vm4 = vcmp.ge.f32.partialorder %v1185_v13, 0.0 }
 0x181   :  { %v484_v17 = vmul.f32 1.442695, %v459_v14  ;;  %v474_v18 = vsub.f32 0.0, %v449_v15  ;;  %v448_v19 = vand.u32 2147483647, %v1189_v16  ;;  %vm548_vm5 = vcmp.ge.f32.partialorder %v1189_v16, 0.0 }
 0x182   :  { %v337_v20 = vpop.xlane.xlu0 %336  ;;  %v340_v21 = vpop.xlane.xlu1 %339 }
 0x183   :  { %824 = vpow2.f32 %v484_v17  ;;  %v514_v22 = vmul.f32 1.442695, %v474_v18  ;;  %v473_v23 = vsub.f32 0.0, %v448_v19  ;;  %v1193_v24 = vadd.f32 %v1178_v8, %v337_v20 }
 0x184   :  { %v1196_v25 = vadd.f32 %v1178_v8, %v340_v21 }
 0x185   :  { %826 = vpow2.f32 %v514_v22  ;;  %v512_v26 = vmul.f32 1.442695, %v473_v23  ;;  %v435_v27 = vand.u32 2147483647, %v1193_v24  ;;  %vm535_vm6 = vcmp.ge.f32.partialorder %v1193_v24, 0.0 }
 0x186   :  { %v436_v28 = vand.u32 2147483647, %v1196_v25  ;;  %v382_v29 = vpop.xlane.xlu0 %381  ;;  %v343_v30 = vpop.xlane.xlu1 %342  ;;  %vm536_vm7 = vcmp.ge.f32.partialorder %v1196_v25, 0.0 }
 0x187   :  { %828 = vpow2.f32 %v512_v26  ;;  %v460_v31 = vsub.f32 0.0, %v435_v27  ;;  %v1201_v32 = vadd.f32 %v1178_v8, %v382_v29  ;;  %v1204_v33 = vadd.f32 %v1178_v8, %v343_v30 }
 0x188   :  { %v461_v34 = vsub.f32 0.0, %v436_v28 }
 0x189   :  { %v486_v35 = vmul.f32 1.442695, %v460_v31  ;;  %v450_v36 = vand.u32 2147483647, %v1201_v32  ;;  %v437_v38 = vand.u32 2147483647, %v1204_v33 }
 0x18a   :  { %v488_v37 = vmul.f32 1.442695, %v461_v34  ;;  %v385_v39 = vpop.xlane.xlu1 %384  ;;  %v346_v40 = vpop.xlane.xlu0 %345  ;;  %vm550_vm8 = vcmp.ge.f32.partialorder %v1201_v32, 0.0  ;;  %vm537_vm9 = vcmp.ge.f32.partialorder %v1204_v33, 0.0 }
 0x18b   :  { %830 = vpow2.f32 %v486_v35  ;;  %v475_v41 = vsub.f32 0.0, %v450_v36  ;;  %v1209_v42 = vadd.f32 %v1178_v8, %v385_v39  ;;  %v1212_v44 = vadd.f32 %v1178_v8, %v346_v40 }
 0x18c   :  { %832 = vpow2.f32 %v488_v37  ;;  %v462_v45 = vsub.f32 0.0, %v437_v38 }
 0x18d   :  { %v1214_v46 = vpop.eup %824  ;;  %v516_v47 = vmul.f32 1.442695, %v475_v41  ;;  %v451_v48 = vand.u32 2147483647, %v1209_v42  ;;  %v438_v51 = vand.u32 2147483647, %v1212_v44 }
 0x18e   :  { %v559_v49 = vadd.f32 1.0, %v1214_v46  ;;  %v490_v50 = vmul.f32 1.442695, %v462_v45  ;;  %v388_v53 = vpop.xlane.xlu0 %387  ;;  %v349_v54 = vpop.xlane.xlu1 %348  ;;  %vm551_vm10 = vcmp.ge.f32.partialorder %v1209_v42, 0.0  ;;  %vm538_vm11 = vcmp.ge.f32.partialorder %v1212_v44, 0.0 }
 0x18f   :  { %v1219_v55 = vpop.eup %826  ;;  %834 = vpow2.f32 %v516_v47  ;;  %v476_v56 = vsub.f32 0.0, %v451_v48  ;;  %v1222_v57 = vadd.f32 %v1178_v8, %v388_v53  ;;  %v1225_v58 = vadd.f32 %v1178_v8, %v349_v54 }
 0x190   :  { %836 = vrcp.f32 %v559_v49  ;;  %v574_v59 = vadd.f32 1.0, %v1219_v55  ;;  %v463_v60 = vsub.f32 0.0, %v438_v51 }
 0x191   :  { %v1228_v61 = vpop.eup %828  ;;  %838 = vpow2.f32 %v490_v50  ;;  %v518_v62 = vmul.f32 1.442695, %v476_v56  ;;  %v452_v63 = vand.u32 2147483647, %v1222_v57  ;;  %v439_v2 = vand.u32 2147483647, %v1225_v58 }
 0x192   :  { %840 = vrcp.f32 %v574_v59  ;;  %v573_v0 = vadd.f32 1.0, %v1228_v61  ;;  %v492_v1 = vmul.f32 1.442695, %v463_v60  ;;  %v391_v3 = vpop.xlane.xlu1 %390  ;;  %v352_v4 = vpop.xlane.xlu0 %351  ;;  %vm552_vm12 = vcmp.ge.f32.partialorder %v1222_v57, 0.0 }
 0x193   :  { %842 = vpow2.f32 %v518_v62  ;;  %v477_v5 = vsub.f32 0.0, %v452_v63  ;;  %v1234_v6 = vadd.f32 %v1178_v8, %v391_v3  ;;  %v464_v7 = vsub.f32 0.0, %v439_v2 }
 0x194   :  { %844 = vrcp.f32 %v573_v0  ;;  %v1237_v43 = vadd.f32 %v1178_v8, %v352_v4  ;;  %vm539_vm13 = vcmp.ge.f32.partialorder %v1225_v58, 0.0 }
 0x195   :  { %v1239_v9 = vpop.eup %830  ;;  %846 = vpow2.f32 %v492_v1  ;;  %v520_v11 = vmul.f32 1.442695, %v477_v5  ;;  %v453_v12 = vand.u32 2147483647, %v1234_v6  ;;  %v494_v15 = vmul.f32 1.442695, %v464_v7 }
 0x196   :  { %v1242_v52 = vpop.eup %832  ;;  %v560_v14 = vadd.f32 1.0, %v1239_v9  ;;  %v440_v17 = vand.u32 2147483647, %v1237_v43  ;;  %v394_v18 = vpop.xlane.xlu0 %393  ;;  %vm553_vm14 = vcmp.ge.f32.partialorder %v1234_v6, 0.0  ;;  %vm540_vm15 = vcmp.ge.f32.partialorder %v1237_v43, 0.0 }
 0x197   :  { %v355_v19 = vpop.xlane.xlu1 %354  ;;  %v561_v20 = vadd.f32 1.0, %v1242_v52  ;;  %848 = vpow2.f32 %v520_v11  ;;  %v478_v21 = vsub.f32 0.0, %v453_v12  ;;  %v1248_v22 = vadd.f32 %v1178_v8, %v394_v18 }
 0x198   :  { %850 = vrcp.f32 %v560_v14  ;;  %v465_v23 = vsub.f32 0.0, %v440_v17  ;;  %v1252_v26 = vadd.f32 %v1178_v8, %v355_v19 }
 0x199   :  { %v1254_v27 = vpop.eup %834  ;;  %852 = vrcp.f32 %v561_v20  ;;  %v522_v28 = vmul.f32 1.442695, %v478_v21  ;;  %v454_v29 = vand.u32 2147483647, %v1248_v22  ;;  %vm554_vm0 = vcmp.ge.f32.partialorder %v1248_v22, 0.0 }
 0x19a   :  { %v837_v30 = vpop.eup %836  ;;  %v575_v31 = vadd.f32 1.0, %v1254_v27  ;;  %854 = vpow2.f32 %v494_v15  ;;  %v496_v34 = vmul.f32 1.442695, %v465_v23  ;;  %v441_v35 = vand.u32 2147483647, %v1252_v26  ;;  %v358_v37 = vpop.xlane.xlu0 %357 }
 0x19b   :  { %v397_v36 = vpop.xlane.xlu1 %396  ;;  %v1260_v38 = vpop.eup %838  ;;  %v634_v39 = vmul.f32 %v837_v30, %v1214_v46  ;;  %856 = vpow2.f32 %v522_v28  ;;  %v479_v40 = vsub.f32 0.0, %v454_v29  ;;  %v1291_v2 = vadd.f32 %v1178_v8, %v358_v37 }
 0x19c   :  { %v841_v41 = vpop.eup %840  ;;  %858 = vrcp.f32 %v575_v31  ;;  %v562_v45 = vadd.f32 1.0, %v1260_v38  ;;  %v466_v47 = vsub.f32 0.0, %v441_v35  ;;  %v1266_v48 = vadd.f32 %v1178_v8, %v397_v36 }
 0x19d   :  { %v1268_v49 = vpop.eup %842  ;;  %v659_v50 = vsel %vm534_vm3, %v837_v30, %v634_v39  ;;  %v649_v51 = vmul.f32 %v841_v41, %v1219_v55  ;;  %860 = vpow2.f32 %v496_v34  ;;  %v524_v46 = vmul.f32 1.442695, %v479_v40 }
 0x19e   :  { %v845_v53 = vpop.eup %844  ;;  %685 = vst.msk [vmem:[%s1492_s5] sm:$0xff] %vm684_vm2, %v659_v50  ;;  %862 = vrcp.f32 %v562_v45  ;;  %v576_v54 = vadd.f32 1.0, %v1268_v49  ;;  %v498_v56 = vmul.f32 1.442695, %v466_v47  ;;  %v455_v59 = vand.u32 2147483647, %v1266_v48  ;;  %v400_v60 = vpop.xlane.xlu0 %399 }
 0x19f   :  { %v361_v62 = vpop.xlane.xlu1 %360  ;;  %v1279_v10 = vpop.eup %846  ;;  %v674_v55 = vsel %vm549_vm4, %v841_v41, %v649_v51  ;;  %v648_v63 = vmul.f32 %v845_v53, %v1228_v61  ;;  %864 = vpow2.f32 %v524_v46  ;;  %v1298_v61 = vadd.f32 %v1178_v8, %v400_v60 }
 0x1a0   :  { %700 = vst.msk [vmem:[%s1492_s5 + $0x78] sm:$0xff] %vm684_vm2, %v674_v55  ;;  %866 = vrcp.f32 %v576_v54  ;;  %v563_v0 = vadd.f32 1.0, %v1279_v10  ;;  %v480_v1 = vsub.f32 0.0, %v455_v59  ;;  %v1301_v4 = vadd.f32 %v1178_v8, %v361_v62 }
 0x1a1   :  { %v1293_v3 = vpop.eup %848  ;;  %v673_v13 = vsel %vm548_vm5, %v845_v53, %v648_v63  ;;  %868 = vpow2.f32 %v498_v56  ;;  %v442_v16 = vand.u32 2147483647, %v1291_v2  ;;  %v456_v15 = vand.u32 2147483647, %v1298_v61 }
 0x1a2   :  { %v851_v5 = vpop.eup %850  ;;  %699 = vst.msk [vmem:[%s1492_s5 + $0x70] sm:$0xff] %vm684_vm2, %v673_v13  ;;  %870 = vrcp.f32 %v563_v0  ;;  %v577_v7 = vadd.f32 1.0, %v1293_v3  ;;  %v526_v11 = vmul.f32 1.442695, %v480_v1  ;;  %v443_v20 = vand.u32 2147483647, %v1301_v4  ;;  %v364_v29 = vpop.xlane.xlu0 %363 }
 0x1a3   :  { %v853_v12 = vpop.eup %852  ;;  %v635_v14 = vmul.f32 %v851_v5, %v1239_v9  ;;  %v467_v19 = vsub.f32 0.0, %v442_v16  ;;  %v481_v28 = vsub.f32 0.0, %v456_v15  ;;  %v1339_v45 = vadd.f32 %v1178_v8, %v364_v29 }
 0x1a4   :  { %v1313_v17 = vpop.eup %854  ;;  %v636_v18 = vmul.f32 %v853_v12, %v1242_v52  ;;  %872 = vrcp.f32 %v577_v7  ;;  %v468_v35 = vsub.f32 0.0, %v443_v20  ;;  %v367_v24 = vpop.xlane.xlu1 %366  ;;  %vm541_vm1 = vcmp.ge.f32.partialorder %v1252_v26, 0.0 }
 0x1a5   :  { %v1317_v21 = vpop.eup %856  ;;  %v660_v23 = vsel %vm535_vm6, %v851_v5, %v635_v14  ;;  %v564_v9 = vadd.f32 1.0, %v1313_v17  ;;  %874 = vpow2.f32 %v526_v11  ;;  %v500_v34 = vmul.f32 1.442695, %v467_v19 }
 0x1a6   :  { %v859_v30 = vpop.eup %858  ;;  %686 = vst.msk [vmem:[%s1492_s5 + $0x8] sm:$0xff] %vm684_vm2, %v660_v23  ;;  %v661_v52 = vsel %vm536_vm7, %v853_v12, %v636_v18  ;;  %v578_v31 = vadd.f32 1.0, %v1317_v21  ;;  %v528_v39 = vmul.f32 1.442695, %v481_v28  ;;  %v502_v41 = vmul.f32 1.442695, %v468_v35 }
 0x1a7   :  { %v1329_v36 = vpop.eup %860  ;;  %687 = vst.msk [vmem:[%s1492_s5 + $0x10] sm:$0xff] %vm684_vm2, %v661_v52  ;;  %v650_v37 = vmul.f32 %v859_v30, %v1254_v27  ;;  %876 = vrcp.f32 %v564_v9  ;;  %v1347_v27 = vadd.f32 %v1178_v8, %v367_v24  ;;  %v444_v32 = vand.u32 2147483647, %v1339_v45 }
 0x1a8   :  { %v863_v25 = vpop.eup %862  ;;  %878 = vrcp.f32 %v578_v31  ;;  %v565_v40 = vadd.f32 1.0, %v1329_v36  ;;  %vm555_vm3 = vcmp.ge.f32.partialorder %v1266_v48, 0.0  ;;  %vm542_vm4 = vcmp.ge.f32.partialorder %v1291_v2, 0.0 }
 0x1a9   :  { %v1341_v47 = vpop.eup %864  ;;  %v675_v50 = vsel %vm550_vm8, %v859_v30, %v650_v37  ;;  %v637_v51 = vmul.f32 %v863_v25, %v1260_v38  ;;  %880 = vpow2.f32 %v500_v34  ;;  %v445_v60 = vand.u32 2147483647, %v1347_v27 }
 0x1aa   :  { %v867_v46 = vpop.eup %866  ;;  %701 = vst.msk [vmem:[%s1492_s5 + $0x80] sm:$0xff] %vm684_vm2, %v675_v50  ;;  %882 = vrcp.f32 %v565_v40  ;;  %v579_v53 = vadd.f32 1.0, %v1341_v47  ;;  %v370_v54 = vpop.xlane.xlu0 %369  ;;  %v469_v63 = vsub.f32 0.0, %v444_v32  ;;  %vm556_vm5 = vcmp.ge.f32.partialorder %v1298_v61, 0.0 }
 0x1ab   :  { %v1356_v56 = vpop.eup %868  ;;  %v662_v38 = vsel %vm537_vm9, %v863_v25, %v637_v51  ;;  %v651_v59 = vmul.f32 %v867_v46, %v1268_v49  ;;  %884 = vpow2.f32 %v528_v39  ;;  %v470_v1 = vsub.f32 0.0, %v445_v60 }
 0x1ac   :  { %v871_v62 = vpop.eup %870  ;;  %688 = vst.msk [vmem:[%s1492_s5 + $0x18] sm:$0xff] %vm684_vm2, %v662_v38  ;;  %886 = vrcp.f32 %v579_v53  ;;  %v566_v55 = vadd.f32 1.0, %v1356_v56  ;;  %v373_v0 = vpop.xlane.xlu1 %372  ;;  %v504_v5 = vmul.f32 1.442695, %v469_v63  ;;  %v1376_v7 = vadd.f32 %v1178_v8, %v370_v54 }
 0x1ad   :  { %v676_v33 = vsel %vm551_vm10, %v867_v46, %v651_v59  ;;  %v638_v49 = vmul.f32 %v871_v62, %v1279_v10  ;;  %888 = vpow2.f32 %v502_v41  ;;  %v1379_v11 = vadd.f32 %v1178_v8, %v373_v0 }
 0x1ae   :  { %v873_v13 = vpop.eup %872  ;;  %702 = vst.msk [vmem:[%s1492_s5 + $0x88] sm:$0xff] %vm684_vm2, %v676_v33  ;;  %890 = vrcp.f32 %v566_v55  ;;  %v406_v42 = vpop.xlane.xlu0 %405  ;;  %v506_v14 = vmul.f32 1.442695, %v470_v1  ;;  %v446_v19 = vand.u32 2147483647, %v1376_v7  ;;  %vm543_vm6 = vcmp.ge.f32.partialorder %v1301_v4, 0.0 }
 0x1af   :  { %v1381_v16 = vpop.eup %874  ;;  %v663_v10 = vsel %vm538_vm11, %v871_v62, %v638_v49  ;;  %v652_v12 = vmul.f32 %v873_v13, %v1293_v3  ;;  %v1387_v15 = vadd.f32 %v1178_v8, %v406_v42  ;;  %892 = vpow2.f32 %v504_v5 }
 0x1b0   :  { %689 = vst.msk [vmem:[%s1492_s5 + $0x20] sm:$0xff] %vm684_vm2, %v663_v10  ;;  %v580_v18 = vadd.f32 1.0, %v1381_v16  ;;  %v403_v44 = vpop.xlane.xlu1 %402  ;;  %894 = vpow2.f32 %v506_v14  ;;  %v447_v3 = vand.u32 2147483647, %v1379_v11  ;;  %v471_v28 = vsub.f32 0.0, %v446_v19 }
 0x1b1   :  { %v877_v20 = vpop.eup %876  ;;  %v677_v23 = vsel %vm552_vm12, %v873_v13, %v652_v12  ;;  %v458_v29 = vand.u32 2147483647, %v1387_v15  ;;  %v1407_v31 = vadd.f32 %v1178_v8, %v403_v44  ;;  %vm544_vm7 = vcmp.ge.f32.partialorder %v1339_v45, 0.0 }
 0x1b2   :  { %v879_v9 = vpop.eup %878  ;;  %703 = vst.msk [vmem:[%s1492_s5 + $0x90] sm:$0xff] %vm684_vm2, %v677_v23  ;;  %v639_v57 = vmul.f32 %v877_v20, %v1313_v17  ;;  %896 = vrcp.f32 %v580_v18  ;;  %v472_v52 = vsub.f32 0.0, %v447_v3  ;;  %v508_v37 = vmul.f32 1.442695, %v471_v28 }
 0x1b3   :  { %v881_v30 = vpop.eup %880  ;;  %v653_v58 = vmul.f32 %v879_v9, %v1317_v21  ;;  %v483_v39 = vsub.f32 0.0, %v458_v29  ;;  %v457_v21 = vand.u32 2147483647, %v1407_v31  ;;  %vm545_vm8 = vcmp.ge.f32.partialorder %v1347_v27, 0.0 }
 0x1b4   :  { %v883_v34 = vpop.eup %882  ;;  %v664_v35 = vsel %vm539_vm13, %v877_v20, %v639_v57  ;;  %v567_v24 = vadd.f32 1.0, %v881_v30  ;;  %v510_v40 = vmul.f32 1.442695, %v472_v52  ;;  %vm546_vm9 = vcmp.ge.f32.partialorder %v1376_v7, 0.0 }
 0x1b5   :  { %v885_v25 = vpop.eup %884  ;;  %690 = vst.msk [vmem:[%s1492_s5 + $0x28] sm:$0xff] %vm684_vm2, %v664_v35  ;;  %v678_v17 = vsel %vm553_vm14, %v879_v9, %v653_v58  ;;  %v640_v6 = vmul.f32 %v883_v34, %v1329_v36  ;;  %v532_v50 = vmul.f32 1.442695, %v483_v39  ;;  %v482_v36 = vsub.f32 0.0, %v457_v21 }
 0x1b6   :  { %v887_v41 = vpop.eup %886  ;;  %704 = vst.msk [vmem:[%s1492_s5 + $0x98] sm:$0xff] %vm684_vm2, %v678_v17  ;;  %898 = vrcp.f32 %v567_v24  ;;  %v581_v8 = vadd.f32 1.0, %v885_v25  ;;  %vm547_vm10 = vcmp.ge.f32.partialorder %v1379_v11, 0.0  ;;  %vm558_vm11 = vcmp.ge.f32.partialorder %v1387_v15, 0.0 }
 0x1b7   :  { %v889_v51 = vpop.eup %888  ;;  %v665_v46 = vsel %vm540_vm15, %v883_v34, %v640_v6  ;;  %v654_v53 = vmul.f32 %v887_v41, %v1341_v47  ;;  %900 = vpow2.f32 %v508_v37  ;;  %v530_v59 = vmul.f32 1.442695, %v482_v36 }
 0x1b8   :  { %v891_v32 = vpop.eup %890  ;;  %691 = vst.msk [vmem:[%s1492_s5 + $0x30] sm:$0xff] %vm684_vm2, %v665_v46  ;;  %902 = vrcp.f32 %v581_v8  ;;  %v568_v54 = vadd.f32 1.0, %v889_v51  ;;  %vm557_vm12 = vcmp.ge.f32.partialorder %v1407_v31, 0.0 }
 0x1b9   :  { %v679_v43 = vsel %vm554_vm0, %v887_v41, %v654_v53  ;;  %v641_v38 = vmul.f32 %v891_v32, %v1356_v56  ;;  %904 = vpow2.f32 %v510_v40  ;;  %v893_v60 = vpop.eup %892 }
 0x1ba   :  { %705 = vst.msk [vmem:[%s1492_s5 + $0xa0] sm:$0xff] %vm684_vm2, %v679_v43  ;;  %906 = vrcp.f32 %v568_v54  ;;  %v895_v47 = vpop.eup %894  ;;  %v569_v55 = vadd.f32 1.0, %v893_v60 }
 0x1bb   :  { %v666_v62 = vsel %vm541_vm1, %v891_v32, %v641_v38  ;;  %908 = vpow2.f32 %v532_v50  ;;  %v570_v56 = vadd.f32 1.0, %v895_v47 }
 0x1bc   :  { %v897_v22 = vpop.eup %896  ;;  %692 = vst.msk [vmem:[%s1492_s5 + $0x38] sm:$0xff] %vm684_vm2, %v666_v62  ;;  %910 = vpow2.f32 %v530_v59 }
 0x1bd   :  { %v655_v63 = vmul.f32 %v897_v22, %v1381_v16  ;;  %912 = vrcp.f32 %v569_v55 }
 0x1be   :  { %914 = vrcp.f32 %v570_v56 }
 0x1bf   :  { %v680_v26 = vsel %vm555_vm3, %v897_v22, %v655_v63 }
 0x1c0   :  { %v899_v0 = vpop.eup %898  ;;  %706 = vst.msk [vmem:[%s1492_s5 + $0xa8] sm:$0xff] %vm684_vm2, %v680_v26 }
 0x1c1   :  { %v901_v33 = vpop.eup %900  ;;  %v642_v49 = vmul.f32 %v899_v0, %v881_v30 }
 0x1c2   :  { %v903_v1 = vpop.eup %902  ;;  %v571_v13 = vadd.f32 1.0, %v901_v33 }
 0x1c3   :  { %v905_v5 = vpop.eup %904  ;;  %v667_v42 = vsel %vm542_vm4, %v899_v0, %v642_v49  ;;  %v656_v16 = vmul.f32 %v903_v1, %v885_v25 }
 0x1c4   :  { %v907_v10 = vpop.eup %906  ;;  %693 = vst.msk [vmem:[%s1492_s5 + $0x40] sm:$0xff] %vm684_vm2, %v667_v42  ;;  %916 = vrcp.f32 %v571_v13  ;;  %v572_v48 = vadd.f32 1.0, %v905_v5 }
 0x1c5   :  { %v909_v12 = vpop.eup %908  ;;  %v681_v14 = vsel %vm556_vm5, %v903_v1, %v656_v16  ;;  %v643_v18 = vmul.f32 %v907_v10, %v889_v51 }
 0x1c6   :  { %v911_v19 = vpop.eup %910  ;;  %707 = vst.msk [vmem:[%s1492_s5 + $0xb0] sm:$0xff] %vm684_vm2, %v681_v14  ;;  %918 = vrcp.f32 %v572_v48  ;;  %v583_v2 = vadd.f32 1.0, %v909_v12 }
 0x1c7   :  { %v913_v44 = vpop.eup %912  ;;  %v668_v20 = vsel %vm543_vm6, %v907_v10, %v643_v18  ;;  %v582_v23 = vadd.f32 1.0, %v911_v19 }
 0x1c8   :  { %v915_v3 = vpop.eup %914  ;;  %694 = vst.msk [vmem:[%s1492_s5 + $0x48] sm:$0xff] %vm684_vm2, %v668_v20  ;;  %v644_v61 = vmul.f32 %v913_v44, %v893_v60  ;;  %920 = vrcp.f32 %v583_v2 }
 0x1c9   :  { %v645_v9 = vmul.f32 %v915_v3, %v895_v47  ;;  %922 = vrcp.f32 %v582_v23 }
 0x1ca   :  { %v669_v57 = vsel %vm544_vm7, %v913_v44, %v644_v61 }
 0x1cb   :  { %695 = vst.msk [vmem:[%s1492_s5 + $0x50] sm:$0xff] %vm684_vm2, %v669_v57  ;;  %v670_v4 = vsel %vm545_vm8, %v915_v3, %v645_v9 }
 0x1cc   :  { %696 = vst.msk [vmem:[%s1492_s5 + $0x58] sm:$0xff] %vm684_vm2, %v670_v4 }
 0x1ce   :  { %v917_v28 = vpop.eup %916 }
 0x1cf   :  { %v646_v29 = vmul.f32 %v917_v28, %v901_v33 }
 0x1d0   :  { %v919_v30 = vpop.eup %918 }
 0x1d1   :  { %v671_v45 = vsel %vm546_vm9, %v917_v28, %v646_v29  ;;  %v647_v58 = vmul.f32 %v919_v30, %v905_v5 }
 0x1d2   :  { %v921_v52 = vpop.eup %920  ;;  %697 = vst.msk [vmem:[%s1492_s5 + $0x60] sm:$0xff] %vm684_vm2, %v671_v45 }
 0x1d3   :  { %v923_v27 = vpop.eup %922  ;;  %v672_v34 = vsel %vm547_vm10, %v919_v30, %v647_v58  ;;  %v658_v35 = vmul.f32 %v921_v52, %v909_v12 }
 0x1d4   :  { %698 = vst.msk [vmem:[%s1492_s5 + $0x68] sm:$0xff] %vm684_vm2, %v672_v34  ;;  %v657_v7 = vmul.f32 %v923_v27, %v911_v19 }
 0x1d5   :  { %v683_v24 = vsel %vm558_vm11, %v921_v52, %v658_v35 }
 0x1d6   :  { %709 = vst.msk [vmem:[%s1492_s5 + $0xc0] sm:$0xff] %vm684_vm2, %v683_v24  ;;  %v682_v11 = vsel %vm557_vm12, %v923_v27, %v657_v7 }
 0x1d7   :  { %708 = vst.msk [vmem:[%s1492_s5 + $0xb8] sm:$0xff] %vm684_vm2, %v682_v11 }

</bundles_post_ra>
